<compile_context>
chip_gen: v7x
topology: tpu7x:2x2x1
jax: 0.10.0
libtpu: 0.0.40
codegen_flags: <defaults>
</compile_context>

<pallas_src>
import functools
import math

import jax
import jax.numpy as jnp
from jax.experimental import pallas as pl
from jax.experimental.pallas import tpu as pltpu


_LANE = 128
# Combined (input + f32 output) byte budget per grid step; double-buffered by
# the Pallas pipeline -> ~2x this resident in VMEM.
_TARGET_STEP_BYTES = 8 * 1024 * 1024
_VMEM_LIMIT_BYTES = 40 * 1024 * 1024
_SMALL_BYPASS_BYTES = 256 * 1024
_WIDTH_CANDIDATES = (4096, 2048, 1024, 512, 256, 128)


def _round_up(v: int, m: int) -> int:
    return -(-v // m) * m


def _sublane_multiple(dtype) -> int:
    # Sub-32-bit dtypes pack along sublanes: 8 rows for 32-bit, 16 for 16-bit,
    # 32 for 8-bit.
    itemsize = jnp.dtype(dtype).itemsize
    return 8 * max(1, 4 // itemsize)


@functools.cache
def _num_tensorcores() -> int:
    """Best-effort TensorCores-per-chip detection (v7x: 2, v5e/v6e: 1)."""
    try:
        info = pltpu.get_tpu_info()
        for attr in ("num_cores", "core_count", "num_tensorcores",
                     "tensorcore_count", "cores_per_chip", "num_cores_per_chip"):
            v = getattr(info, attr, None)
            if isinstance(v, int) and v > 0:
                return v
    except Exception:
        pass
    try:
        kind = jax.devices()[0].device_kind.lower()
        if ("v5e" in kind or "v5 lite" in kind or "v5lite" in kind
                or "v6e" in kind or "v6 lite" in kind or "v6lite" in kind):
            return 1
    except Exception:
        pass
    # Unknown / v7x-class: prefer >=2 grid steps so all cores stream HBM.
    return 2


def _ste_kernel(x_ref, o_ref):
    # Elementwise straight-through binarization: (x > 0) -> 1.0 else 0.0
    # (NaN > 0 is False -> 0.0, matching PyTorch.)
    o_ref[...] = (x_ref[...] > 0).astype(o_ref.dtype)


def _pick_width(total: int):
    """Largest lane-dense width (multiple of 128) dividing `total`.

    Prefers widths leaving >=8 rows so the row axis can be tiled/split.
    Returns None if `total` is not a multiple of 128.
    """
    for cw in _WIDTH_CANDIDATES:
        if total % cw == 0 and total // cw >= 8:
            return cw
    for cw in _WIDTH_CANDIDATES:
        if total % cw == 0:
            return cw
    return None


def _ste_2d(x2d: jax.Array) -> jax.Array:
    """Run the STE kernel on a (R, Cw) array with Cw a multiple of 128."""
    R, C = x2d.shape
    itemsize = x2d.dtype.itemsize
    sub = _sublane_multiple(x2d.dtype)

    # Byte-budgeted row tile (input + f32 output), aligned to sublane packing.
    bytes_per_row = C * (itemsize + 4)
    tile_r = max(sub, (_TARGET_STEP_BYTES // bytes_per_row) // sub * sub)

    if tile_r >= R:
        if _num_tensorcores() > 1 and R > sub:
            # Split into >=2 blocks so both TensorCores (v7x) stream HBM.
            tile_r = _round_up(pl.cdiv(R, 2), sub)
        else:
            tile_r = R  # single full-rows block (legal even if R % sub != 0)

    grid = (pl.cdiv(R, tile_r),)

    cost = pl.CostEstimate(
        flops=0,
        transcendentals=0,
        bytes_accessed=int(R * C * (itemsize + 4)),
    )

    return pl.pallas_call(
        _ste_kernel,
        out_shape=jax.ShapeDtypeStruct((R, C), jnp.float32),
        grid_spec=pltpu.PrefetchScalarGridSpec(
            num_scalar_prefetch=0,
            grid=grid,
            in_specs=[pl.BlockSpec((tile_r, C), lambda i: (i, 0))],
            out_specs=pl.BlockSpec((tile_r, C), lambda i: (i, 0)),
        ),
        compiler_params=pltpu.CompilerParams(
            dimension_semantics=("parallel",),
            vmem_limit_bytes=_VMEM_LIMIT_BYTES,
        ),
        cost_estimate=cost,
    )(x2d)


def ste_forward(x: jax.Array) -> jax.Array:
    """Forward of StraightThroughEstimator: (x > 0).astype(float32)."""
    orig_shape = x.shape
    total = math.prod(orig_shape) if orig_shape else 1
    if total == 0:
        return jnp.zeros(orig_shape, jnp.float32)

    # Small-input bypass: pallas_call launch/DMA setup dominates and a custom
    # call blocks XLA elementwise fusion; plain jnp is strictly better here.
    if total * jnp.dtype(x.dtype).itemsize < _SMALL_BYPASS_BYTES:
        return (x > 0).astype(jnp.float32)

    cw = _pick_width(total)
    if cw is not None:
        # Free (contiguous) reshape to a wide lane-dense layout; no padding,
        # no post-kernel slicing.
        out2d = _ste_2d(x.reshape(total // cw, cw))
        return out2d.reshape(orig_shape)

    # Element count not a multiple of 128: kernel on the 128-aligned prefix,
    # tiny (<128 element) tail with plain jnp. No full-tensor pad/slice.
    aligned = (total // _LANE) * _LANE
    x_flat = x.reshape(total)
    cw = _pick_width(aligned)  # aligned is a multiple of 128 -> always found
    head = _ste_2d(x_flat[:aligned].reshape(aligned // cw, cw)).reshape(aligned)
    tail = (x_flat[aligned:] > 0).astype(jnp.float32)
    return jnp.concatenate([head, tail]).reshape(orig_shape)

# TODO(synk): only the forward pass is implemented; the custom STE backward
# (hardtanh on grad_output) would be a separate kernel / custom_vjp.


if __name__ == "__main__":
    key = jax.random.PRNGKey(0)
    k0, k1, k2, k3 = jax.random.split(key, 4)

    # 1) Module-scale NCHW input (small -> exercises the fusion bypass path).
    x_small = jax.random.normal(k0, (2, 4, 16, 16), dtype=jnp.float32)
    y_small = jax.block_until_ready(ste_forward(x_small))
    ref_small = (x_small > 0).astype(jnp.float32)
    assert y_small.shape == ref_small.shape and y_small.dtype == ref_small.dtype
    assert bool(jnp.all(y_small == ref_small))

    # 2) Larger f32 feature map -> main lane-dense kernel path.
    x_f32 = jax.random.normal(k1, (8, 4, 64, 64), dtype=jnp.float32)
    y_f32 = jax.block_until_ready(ste_forward(x_f32))
    assert y_f32.dtype == jnp.float32
    assert bool(jnp.all(y_f32 == (x_f32 > 0).astype(jnp.float32)))

    # 3) bf16 input -> dtype-aware sublane-aligned tiling path.
    x_bf16 = jax.random.normal(k2, (16, 4, 64, 64), dtype=jnp.bfloat16)
    y_bf16 = jax.block_until_ready(ste_forward(x_bf16))
    assert y_bf16.dtype == jnp.float32
    assert bool(jnp.all(y_bf16 == (x_bf16 > 0).astype(jnp.float32)))

    # 4) Element count not a multiple of 128 -> aligned-prefix + jnp-tail path.
    x_rag = jax.random.normal(k3, (4, 260, 65), dtype=jnp.float32)
    y_rag = jax.block_until_ready(ste_forward(x_rag))
    assert y_rag.shape == x_rag.shape
    assert bool(jnp.all(y_rag == (x_rag > 0).astype(jnp.float32)))

    print("KERNEL_OK")
</pallas_src>

<mosaic_0001>
module attributes {stable_mosaic.version = 11 : i64} {
  func.func @_ste_kernel(%arg0: i32, %arg1: memref<16x4096xf32, #tpu.memory_space<vmem>>, %arg2: memref<16x4096xf32, #tpu.memory_space<vmem>>) attributes {dimension_semantics = [#tpu.dimension_semantics<parallel>], iteration_bounds = array<i64: 2>, scalar_prefetch = 0 : i64, scratch_operands = 0 : i64, tpu.core_type = #tpu.core_type<tc>, window_params = [{transform_indices = @transform_0, window_bounds = array<i64: 16, 4096>}, {transform_indices = @transform_1, window_bounds = array<i64: 16, 4096>}]} {
    %c0 = arith.constant 0 : index
    %c0_0 = arith.constant 0 : index
    %0 = vector.load %arg1[%c0, %c0_0] : memref<16x4096xf32, #tpu.memory_space<vmem>>, vector<16x4096xf32>
    %cst = arith.constant 0.000000e+00 : f32
    %1 = vector.broadcast %cst : f32 to vector<16x4096xf32>
    %2 = arith.cmpf ogt, %0, %1 : vector<16x4096xf32>
    %3 = arith.extui %2 : vector<16x4096xi1> to vector<16x4096xi32>
    %4 = arith.sitofp %3 : vector<16x4096xi32> to vector<16x4096xf32>
    %c0_1 = arith.constant 0 : index
    %c0_2 = arith.constant 0 : index
    %5 = vector.load %arg2[%c0_1, %c0_2] : memref<16x4096xf32, #tpu.memory_space<vmem>>, vector<16x4096xf32>
    tpu.vector_store %arg2[%c0_1, %c0_2], %4 {strides = array<i32>} : memref<16x4096xf32, #tpu.memory_space<vmem>>, vector<16x4096xf32>,
    return
  }
  func.func @transform_0(%arg0: i32) -> (i32, i32) {
    %c0_i32 = arith.constant 0 : i32
    %c0_i32_0 = arith.constant 0 : i32
    return %arg0, %c0_i32 : i32, i32
  }
  func.func @transform_1(%arg0: i32) -> (i32, i32) {
    %c0_i32 = arith.constant 0 : i32
    %c0_i32_0 = arith.constant 0 : i32
    return %arg0, %c0_i32 : i32, i32
  }
}

</mosaic_0001>

<bundles_post_ra>
// kernel: tpu_custom_call.1
= control target key start
LH: loop header
LB: loop body
LE: loop exit
PB: predicated region body
PF: predicated region fallthrough
CT: control target
= control target key end

     0   :  { %6 = vsyncpa [#allocation3], 0  ;;  %s1159_s0 = inlined_call_operand.hbm [shape: f32[32,4096], index: 0, kind: input, shape index: {}]   ;;  %s1160_s1 = inlined_call_operand.hbm [shape: f32[32,4096], index: 1, kind: output, shape index: {}]  }
   0x1   :  { %8 = vsyncpa [#allocation3 + $0x1], 0 }
   0x2   :  { %9 = vsyncpa [#allocation4], 0 }
   0x3   :  { %11 = vsyncpa [#allocation4 + $0x1], 0  ;;  %s796_s6 = smov 0   ;;  %s798_s7 = smov 0  }
   0x4   :  { %s800_s8 = smov 0   ;;  %s802_s9 = smov 0  }
   0x5 LB: > { %s817_s10 = sadd.s32 4294967295, %s777_s9   ;;  %s546_s11 = sadd.s32 4294967294, %s777_s9   ;;  %s777_s9 = sphi %s802_s9, %s1173_s9   ;;  %s773_s8 = sphi %s800_s8, %s1172_s8   ;;  %s769_s7 = sphi %s798_s7, %s1171_s7   ;;  %s765_s6 = sphi %s796_s6, %s1170_s6  }
   0x6   : > { %s821_s12 = sadd.s32 1, %s777_s9   ;;  %s24_s13 = sadd.s32 1, %s773_s8 }
   0x7   : > { %s21_s14 = ssub.s32 %s777_s9, %s821_s12  ;;  %p31_p0 = scmp.ne.s32.totalorder %s773_s8, %s769_s7 }
   0x8   : > { %p22_p1 = scmp.eq.s32.totalorder %s21_s14, 0  ;;  %p32_p2 = scmp.eq.s32.totalorder %s777_s9, 0 }
   0x9   : > { %p37_p3 = scmp.ne.s32.totalorder %s769_s7, %s765_s6  ;;  %p38_p4 = scmp.eq.s32.totalorder %s817_s10, 0 }
   0xa   : > { %s833_s15 = scalar_select %p22_p1, %s773_s8, %s24_s13  }
   0xb   : > { %p835_p5 = por %p32_p2, %p31_p0  ;;  %p839_p6 = por %p38_p4, %p37_p3 }
   0xc   : > { %p61_p7 = scmp.eq.s32.totalorder %s817_s10, 1  ;;  %p67_p8 = scmp.eq.s32.totalorder %s546_s11, 1 }
   0xd   : > { %p642_p10 = scmp.lt.s32.totalorder %s777_s9, 2  ;;  %s87_s20 = sand.u32 1, %s773_s8  }
   0xe   : > { %p846_p11 = por %p61_p7, %p31_p0  ;;  %p850_p12 = por %p67_p8, %p37_p3 }
   0xf   : > { %s627_s21 = sshll.u32 %s777_s9, 13  ;;  %s549_s22 = sshll.u32 %s87_s20, 9 }
  0x10   : > { %s1164_s18 = scalar_select %p846_p11, 1, 0 }
  0x11   : > { %s1165_s19 = scalar_select %p850_p12, 1, 0 }
  0x12   : > { %s859_s25 = scalar_lea.hbm %s1159_s0, %s627_s21  ;;  %s91_s26 = scalar_lea.vmem [#allocation2], %s549_s22 }
  0x13   : > { %s99_s27 = sshll.u32 %s91_s26, 4  ;;  %p863_p13 = pnand %p642_p10, %p835_p5  ;;  %s867_s27 = int_to_ptr.vmem [resolvable:$true] %s99_s27 }
  0x14   : > { %s869_s29 = scalar_lea.sflag [#allocation3], %s87_s20  ;;  %s681_s30 = scalar_lea.hbm %s859_s25, 8192 }
  0x15   : > { %p682_p0 = scmp.ne.s32.totalorder %s859_s25, %s681_s30  ;;  %p683_p1 = pneg %p863_p13 }
  0x16   : > { %s686_s4 = scalar_lea.hbm %s1159_s0, 16384  ;;  %p687_p4 = scmp.lt.u32.totalorder %s859_s25, %s1159_s0 }
  0x17   : > { %p684_p2 = pnand %p683_p1, %p682_p0  ;;  %p688_p5 = scmp.lt.u32.totalorder %s686_s4, %s681_s30 }
  0x18   : > { %p690_p8 = scmp.lt.u32.totalorder %s681_s30, %s859_s25 }
  0x19   : > { %p685_p3 = pneg %p684_p2  ;;  %p689_p7 = por %p688_p5, %p687_p4 }
  0x1b   : > { %p691_p10 = por %p690_p8, %p689_p7 }
  0x1d   : > { %p692_p9 = pnand %p691_p10, %p685_p3 }
  0x1f   : > { %695 = shalt.err (!%p692_p9)
}
  0x20   : > { %s696_s13 = scalar_lea.vmem %s867_s27, 8192  ;;  %s779_s14 = smov [#allocation2]  }
  0x21   : > { %p697_p0 = scmp.ne.s32.totalorder %s867_s27, %s696_s13  ;;  %s701_s16 = sshll.u32 %s779_s14, 4  ;;  %s702_s16 = int_to_ptr.vmem [resolvable:$false] %s701_s16 }
  0x22   : > { %s703_s20 = scalar_lea.vmem %s702_s16, 16384  ;;  %p704_p11 = scmp.lt.s32.totalorder %s867_s27, %s702_s16 }
  0x23   : > { %p699_p2 = pnand %p697_p0, %p683_p1  ;;  %p705_p4 = scmp.lt.s32.totalorder %s703_s20, %s696_s13 }
  0x25   : > { %p700_p12 = pneg %p699_p2  ;;  %p706_p5 = por %p705_p4, %p704_p11 }
  0x27   : > { %p707_p7 = pnand %p706_p5, %p700_p12 }
  0x29   : > { %710 = shalt.err (!%p707_p7)
}
  0x2a   : > { %s780_s21 = smov 4096   ;;  %s781_s22 = smov 256  }
  0x2b   : > { %637 = dma.hbm_to_vmem [thread:$0]  (!%p863_p13), %s859_s25, 8192, %s867_s27, %s869_s29, %s780_s21, %s780_s21, %s781_s22  }
  0x2c   : > { %p553_p9 = scmp.ge.s32.totalorder %s777_s9, 1  ;;  %p107_p1 = scmp.lt.s32.totalorder %s777_s9, 3 }
  0x2e   : > { %p108_p3 = pnand %p553_p9, %p107_p1 }
  0x2f   : > { %s900_s23 = sand.u32 (!%p108_p3), 1, %s769_s7  }
  0x30   : > { %111 = sbr.rel (%p108_p3) target bundleno = 123 (0x7b), region = 24  ;;  %s554_s24 = sshll.u32 (!%p108_p3), %s900_s23, 9 }
  0x31   : > { %s114_s26 = scalar_lea.sflag (!%p108_p3), [#allocation3], %s900_s23  ;;  %s904_s30 = scalar_lea.vmem (!%p108_p3), [#allocation2], %s554_s24 }
  0x37   : > { %756 = dma.done.wait (%p839_p6), %s114_s26, 8192  }
  0x38   : > { %758 = vsyncadd (%p839_p6), %s114_s26, 4294959104  ;;  %v138_v0 = vld [vmem:[%s904_s30] sm:$0xff]  ;;  %v139_v1 = vld [vmem:[%s904_s30 + $0x8] sm:$0xff]  ;;  %s629_s25 = sshll.u32 %s817_s10, 13  ;;  %s914_s27 = scalar_lea.vmem [#allocation5], %s554_s24  ;;  %v782_v6 = vmov 0.0  }
  0x39   : > { %v140_v2 = vld [vmem:[%s904_s30 + $0x10] sm:$0xff]  ;;  %s473_s17 = sshll.u32 %s914_s27, 4  ;;  %vm202_vm0 = vcmp.gt.f32.partialorder %v138_v0, 0.0  ;;  %vm203_vm1 = vcmp.gt.f32.partialorder %v139_v1, 0.0  ;;  %v141_v3 = vld [vmem:[%s904_s30 + $0x18] sm:$0xff]  ;;  %v142_v4 = vld [vmem:[%s904_s30 + $0x20] sm:$0xff]  ;;  %s1102_s2 = scalar_lea.hbm %s1160_s1, %s629_s25  ;;  %s1106_s17 = int_to_ptr.vmem [resolvable:$true] %s473_s17 }
  0x3a   : > { %vm204_vm2 = vcmp.gt.f32.partialorder %v140_v2, 0.0  ;;  %v143_v5 = vld [vmem:[%s904_s30 + $0x28] sm:$0xff]  ;;  %v556_v7 = vsel %vm202_vm0, 1.0, %v782_v6  ;;  %v557_v8 = vsel %vm203_vm1, 1.0, %v782_v6  ;;  %vm205_vm3 = vcmp.gt.f32.partialorder %v141_v3, 0.0  ;;  %v144_v10 = vld [vmem:[%s904_s30 + $0x30] sm:$0xff] }
  0x3b   : > { %v558_v9 = vsel %vm204_vm2, 1.0, %v782_v6  ;;  %v145_v11 = vld [vmem:[%s904_s30 + $0x38] sm:$0xff]  ;;  %394 = vst [vmem:[%s914_s27] sm:$0xff] %v556_v7  ;;  %395 = vst [vmem:[%s914_s27 + $0x8] sm:$0xff] %v557_v8  ;;  %v559_v12 = vsel %vm205_vm3, 1.0, %v782_v6  ;;  %vm206_vm4 = vcmp.gt.f32.partialorder %v142_v4, 0.0  ;;  %vm207_vm5 = vcmp.gt.f32.partialorder %v143_v5, 0.0 }
  0x3c   : > { %396 = vst [vmem:[%s914_s27 + $0x10] sm:$0xff] %v558_v9  ;;  %vm208_vm6 = vcmp.gt.f32.partialorder %v144_v10, 0.0  ;;  %v146_v13 = vld [vmem:[%s904_s30 + $0x40] sm:$0xff]  ;;  %v147_v14 = vld [vmem:[%s904_s30 + $0x48] sm:$0xff]  ;;  %397 = vst [vmem:[%s914_s27 + $0x18] sm:$0xff] %v559_v12  ;;  %v560_v15 = vsel %vm206_vm4, 1.0, %v782_v6 }
  0x3d   : > { %v561_v16 = vsel %vm207_vm5, 1.0, %v782_v6  ;;  %v562_v17 = vsel %vm208_vm6, 1.0, %v782_v6  ;;  %vm209_vm7 = vcmp.gt.f32.partialorder %v145_v11, 0.0  ;;  %v148_v18 = vld [vmem:[%s904_s30 + $0x50] sm:$0xff]  ;;  %v149_v19 = vld [vmem:[%s904_s30 + $0x58] sm:$0xff]  ;;  %398 = vst [vmem:[%s914_s27 + $0x20] sm:$0xff] %v560_v15 }
  0x3e   : > { %399 = vst [vmem:[%s914_s27 + $0x28] sm:$0xff] %v561_v16  ;;  %400 = vst [vmem:[%s914_s27 + $0x30] sm:$0xff] %v562_v17  ;;  %v563_v20 = vsel %vm209_vm7, 1.0, %v782_v6  ;;  %vm210_vm8 = vcmp.gt.f32.partialorder %v146_v13, 0.0  ;;  %vm211_vm9 = vcmp.gt.f32.partialorder %v147_v14, 0.0  ;;  %vm212_vm10 = vcmp.gt.f32.partialorder %v148_v18, 0.0 }
  0x3f   : > { %v150_v21 = vld [vmem:[%s904_s30 + $0x60] sm:$0xff]  ;;  %v151_v22 = vld [vmem:[%s904_s30 + $0x68] sm:$0xff]  ;;  %401 = vst [vmem:[%s914_s27 + $0x38] sm:$0xff] %v563_v20  ;;  %v564_v23 = vsel %vm210_vm8, 1.0, %v782_v6  ;;  %v565_v24 = vsel %vm211_vm9, 1.0, %v782_v6  ;;  %v566_v25 = vsel %vm212_vm10, 1.0, %v782_v6 }
  0x40   : > { %vm213_vm11 = vcmp.gt.f32.partialorder %v149_v19, 0.0  ;;  %v152_v26 = vld [vmem:[%s904_s30 + $0x70] sm:$0xff]  ;;  %v153_v27 = vld [vmem:[%s904_s30 + $0x78] sm:$0xff]  ;;  %402 = vst [vmem:[%s914_s27 + $0x40] sm:$0xff] %v564_v23  ;;  %403 = vst [vmem:[%s914_s27 + $0x48] sm:$0xff] %v565_v24  ;;  %vm214_vm12 = vcmp.gt.f32.partialorder %v150_v21, 0.0 }
  0x41   : > { %404 = vst [vmem:[%s914_s27 + $0x50] sm:$0xff] %v566_v25  ;;  %v567_v28 = vsel %vm213_vm11, 1.0, %v782_v6  ;;  %vm215_vm13 = vcmp.gt.f32.partialorder %v151_v22, 0.0  ;;  %vm216_vm14 = vcmp.gt.f32.partialorder %v152_v26, 0.0  ;;  %v154_v29 = vld [vmem:[%s904_s30 + $0x80] sm:$0xff]  ;;  %v155_v30 = vld [vmem:[%s904_s30 + $0x88] sm:$0xff] }
  0x42   : > { %405 = vst [vmem:[%s914_s27 + $0x58] sm:$0xff] %v567_v28  ;;  %v568_v31 = vsel %vm214_vm12, 1.0, %v782_v6  ;;  %v569_v32 = vsel %vm215_vm13, 1.0, %v782_v6  ;;  %v570_v33 = vsel %vm216_vm14, 1.0, %v782_v6  ;;  %vm217_vm15 = vcmp.gt.f32.partialorder %v153_v27, 0.0  ;;  %v156_v34 = vld [vmem:[%s904_s30 + $0x90] sm:$0xff] }
  0x43   : > { %v157_v35 = vld [vmem:[%s904_s30 + $0x98] sm:$0xff]  ;;  %406 = vst [vmem:[%s914_s27 + $0x60] sm:$0xff] %v568_v31  ;;  %407 = vst [vmem:[%s914_s27 + $0x68] sm:$0xff] %v569_v32  ;;  %v571_v36 = vsel %vm217_vm15, 1.0, %v782_v6  ;;  %vm218_vm0 = vcmp.gt.f32.partialorder %v154_v29, 0.0  ;;  %vm219_vm1 = vcmp.gt.f32.partialorder %v155_v30, 0.0 }
  0x44   : > { %408 = vst [vmem:[%s914_s27 + $0x70] sm:$0xff] %v570_v33  ;;  %vm220_vm2 = vcmp.gt.f32.partialorder %v156_v34, 0.0  ;;  %v158_v37 = vld [vmem:[%s904_s30 + $0xa0] sm:$0xff]  ;;  %v159_v38 = vld [vmem:[%s904_s30 + $0xa8] sm:$0xff]  ;;  %409 = vst [vmem:[%s914_s27 + $0x78] sm:$0xff] %v571_v36  ;;  %v572_v39 = vsel %vm218_vm0, 1.0, %v782_v6 }
  0x45   : > { %v573_v40 = vsel %vm219_vm1, 1.0, %v782_v6  ;;  %v574_v41 = vsel %vm220_vm2, 1.0, %v782_v6  ;;  %vm221_vm3 = vcmp.gt.f32.partialorder %v157_v35, 0.0  ;;  %v160_v42 = vld [vmem:[%s904_s30 + $0xb0] sm:$0xff]  ;;  %v161_v43 = vld [vmem:[%s904_s30 + $0xb8] sm:$0xff]  ;;  %410 = vst [vmem:[%s914_s27 + $0x80] sm:$0xff] %v572_v39 }
  0x46   : > { %411 = vst [vmem:[%s914_s27 + $0x88] sm:$0xff] %v573_v40  ;;  %412 = vst [vmem:[%s914_s27 + $0x90] sm:$0xff] %v574_v41  ;;  %v575_v44 = vsel %vm221_vm3, 1.0, %v782_v6  ;;  %vm222_vm4 = vcmp.gt.f32.partialorder %v158_v37, 0.0  ;;  %vm223_vm5 = vcmp.gt.f32.partialorder %v159_v38, 0.0  ;;  %vm224_vm6 = vcmp.gt.f32.partialorder %v160_v42, 0.0 }
  0x47   : > { %v162_v45 = vld [vmem:[%s904_s30 + $0xc0] sm:$0xff]  ;;  %v163_v46 = vld [vmem:[%s904_s30 + $0xc8] sm:$0xff]  ;;  %413 = vst [vmem:[%s914_s27 + $0x98] sm:$0xff] %v575_v44  ;;  %v576_v47 = vsel %vm222_vm4, 1.0, %v782_v6  ;;  %v577_v48 = vsel %vm223_vm5, 1.0, %v782_v6  ;;  %v578_v49 = vsel %vm224_vm6, 1.0, %v782_v6 }
  0x48   : > { %vm225_vm7 = vcmp.gt.f32.partialorder %v161_v43, 0.0  ;;  %v164_v50 = vld [vmem:[%s904_s30 + $0xd0] sm:$0xff]  ;;  %v165_v51 = vld [vmem:[%s904_s30 + $0xd8] sm:$0xff]  ;;  %414 = vst [vmem:[%s914_s27 + $0xa0] sm:$0xff] %v576_v47  ;;  %415 = vst [vmem:[%s914_s27 + $0xa8] sm:$0xff] %v577_v48  ;;  %vm226_vm8 = vcmp.gt.f32.partialorder %v162_v45, 0.0 }
  0x49   : > { %416 = vst [vmem:[%s914_s27 + $0xb0] sm:$0xff] %v578_v49  ;;  %v579_v52 = vsel %vm225_vm7, 1.0, %v782_v6  ;;  %vm227_vm9 = vcmp.gt.f32.partialorder %v163_v46, 0.0  ;;  %vm228_vm10 = vcmp.gt.f32.partialorder %v164_v50, 0.0  ;;  %v166_v53 = vld [vmem:[%s904_s30 + $0xe0] sm:$0xff]  ;;  %v167_v54 = vld [vmem:[%s904_s30 + $0xe8] sm:$0xff] }
  0x4a   : > { %417 = vst [vmem:[%s914_s27 + $0xb8] sm:$0xff] %v579_v52  ;;  %v580_v55 = vsel %vm226_vm8, 1.0, %v782_v6  ;;  %v581_v56 = vsel %vm227_vm9, 1.0, %v782_v6  ;;  %v582_v57 = vsel %vm228_vm10, 1.0, %v782_v6  ;;  %vm229_vm11 = vcmp.gt.f32.partialorder %v165_v51, 0.0  ;;  %v168_v58 = vld [vmem:[%s904_s30 + $0xf0] sm:$0xff] }
  0x4b   : > { %v169_v59 = vld [vmem:[%s904_s30 + $0xf8] sm:$0xff]  ;;  %418 = vst [vmem:[%s914_s27 + $0xc0] sm:$0xff] %v580_v55  ;;  %419 = vst [vmem:[%s914_s27 + $0xc8] sm:$0xff] %v581_v56  ;;  %v583_v60 = vsel %vm229_vm11, 1.0, %v782_v6  ;;  %vm230_vm12 = vcmp.gt.f32.partialorder %v166_v53, 0.0  ;;  %vm231_vm13 = vcmp.gt.f32.partialorder %v167_v54, 0.0 }
  0x4c   : > { %420 = vst [vmem:[%s914_s27 + $0xd0] sm:$0xff] %v582_v57  ;;  %vm232_vm14 = vcmp.gt.f32.partialorder %v168_v58, 0.0  ;;  %v170_v61 = vld [vmem:[%s904_s30 + $0x100] sm:$0xff]  ;;  %v171_v62 = vld [vmem:[%s904_s30 + $0x108] sm:$0xff]  ;;  %421 = vst [vmem:[%s914_s27 + $0xd8] sm:$0xff] %v583_v60  ;;  %v584_v63 = vsel %vm230_vm12, 1.0, %v782_v6 }
  0x4d   : > { %v585_v0 = vsel %vm231_vm13, 1.0, %v782_v6  ;;  %v586_v1 = vsel %vm232_vm14, 1.0, %v782_v6  ;;  %vm233_vm15 = vcmp.gt.f32.partialorder %v169_v59, 0.0  ;;  %v172_v2 = vld [vmem:[%s904_s30 + $0x110] sm:$0xff]  ;;  %v173_v3 = vld [vmem:[%s904_s30 + $0x118] sm:$0xff]  ;;  %422 = vst [vmem:[%s914_s27 + $0xe0] sm:$0xff] %v584_v63 }
  0x4e   : > { %423 = vst [vmem:[%s914_s27 + $0xe8] sm:$0xff] %v585_v0  ;;  %424 = vst [vmem:[%s914_s27 + $0xf0] sm:$0xff] %v586_v1  ;;  %v587_v4 = vsel %vm233_vm15, 1.0, %v782_v6  ;;  %vm234_vm0 = vcmp.gt.f32.partialorder %v170_v61, 0.0  ;;  %vm235_vm1 = vcmp.gt.f32.partialorder %v171_v62, 0.0  ;;  %vm236_vm2 = vcmp.gt.f32.partialorder %v172_v2, 0.0 }
  0x4f   : > { %v174_v5 = vld [vmem:[%s904_s30 + $0x120] sm:$0xff]  ;;  %v175_v7 = vld [vmem:[%s904_s30 + $0x128] sm:$0xff]  ;;  %425 = vst [vmem:[%s914_s27 + $0xf8] sm:$0xff] %v587_v4  ;;  %v588_v8 = vsel %vm234_vm0, 1.0, %v782_v6  ;;  %v589_v9 = vsel %vm235_vm1, 1.0, %v782_v6  ;;  %v590_v10 = vsel %vm236_vm2, 1.0, %v782_v6 }
  0x50   : > { %vm237_vm3 = vcmp.gt.f32.partialorder %v173_v3, 0.0  ;;  %v176_v11 = vld [vmem:[%s904_s30 + $0x130] sm:$0xff]  ;;  %v177_v12 = vld [vmem:[%s904_s30 + $0x138] sm:$0xff]  ;;  %426 = vst [vmem:[%s914_s27 + $0x100] sm:$0xff] %v588_v8  ;;  %427 = vst [vmem:[%s914_s27 + $0x108] sm:$0xff] %v589_v9  ;;  %vm238_vm4 = vcmp.gt.f32.partialorder %v174_v5, 0.0 }
  0x51   : > { %428 = vst [vmem:[%s914_s27 + $0x110] sm:$0xff] %v590_v10  ;;  %v591_v13 = vsel %vm237_vm3, 1.0, %v782_v6  ;;  %vm239_vm5 = vcmp.gt.f32.partialorder %v175_v7, 0.0  ;;  %vm240_vm6 = vcmp.gt.f32.partialorder %v176_v11, 0.0  ;;  %v178_v14 = vld [vmem:[%s904_s30 + $0x140] sm:$0xff]  ;;  %v179_v15 = vld [vmem:[%s904_s30 + $0x148] sm:$0xff] }
  0x52   : > { %429 = vst [vmem:[%s914_s27 + $0x118] sm:$0xff] %v591_v13  ;;  %v592_v16 = vsel %vm238_vm4, 1.0, %v782_v6  ;;  %v593_v17 = vsel %vm239_vm5, 1.0, %v782_v6  ;;  %v594_v18 = vsel %vm240_vm6, 1.0, %v782_v6  ;;  %vm241_vm7 = vcmp.gt.f32.partialorder %v177_v12, 0.0  ;;  %v180_v19 = vld [vmem:[%s904_s30 + $0x150] sm:$0xff] }
  0x53   : > { %v181_v20 = vld [vmem:[%s904_s30 + $0x158] sm:$0xff]  ;;  %430 = vst [vmem:[%s914_s27 + $0x120] sm:$0xff] %v592_v16  ;;  %431 = vst [vmem:[%s914_s27 + $0x128] sm:$0xff] %v593_v17  ;;  %v595_v21 = vsel %vm241_vm7, 1.0, %v782_v6  ;;  %vm242_vm8 = vcmp.gt.f32.partialorder %v178_v14, 0.0  ;;  %vm243_vm9 = vcmp.gt.f32.partialorder %v179_v15, 0.0 }
  0x54   : > { %432 = vst [vmem:[%s914_s27 + $0x130] sm:$0xff] %v594_v18  ;;  %vm244_vm10 = vcmp.gt.f32.partialorder %v180_v19, 0.0  ;;  %v182_v22 = vld [vmem:[%s904_s30 + $0x160] sm:$0xff]  ;;  %v183_v23 = vld [vmem:[%s904_s30 + $0x168] sm:$0xff]  ;;  %433 = vst [vmem:[%s914_s27 + $0x138] sm:$0xff] %v595_v21  ;;  %v596_v24 = vsel %vm242_vm8, 1.0, %v782_v6 }
  0x55   : > { %v597_v25 = vsel %vm243_vm9, 1.0, %v782_v6  ;;  %v598_v26 = vsel %vm244_vm10, 1.0, %v782_v6  ;;  %vm245_vm11 = vcmp.gt.f32.partialorder %v181_v20, 0.0  ;;  %v184_v27 = vld [vmem:[%s904_s30 + $0x170] sm:$0xff]  ;;  %v185_v28 = vld [vmem:[%s904_s30 + $0x178] sm:$0xff]  ;;  %434 = vst [vmem:[%s914_s27 + $0x140] sm:$0xff] %v596_v24 }
  0x56   : > { %435 = vst [vmem:[%s914_s27 + $0x148] sm:$0xff] %v597_v25  ;;  %436 = vst [vmem:[%s914_s27 + $0x150] sm:$0xff] %v598_v26  ;;  %v599_v29 = vsel %vm245_vm11, 1.0, %v782_v6  ;;  %vm246_vm12 = vcmp.gt.f32.partialorder %v182_v22, 0.0  ;;  %vm247_vm13 = vcmp.gt.f32.partialorder %v183_v23, 0.0  ;;  %vm248_vm14 = vcmp.gt.f32.partialorder %v184_v27, 0.0 }
  0x57   : > { %v186_v30 = vld [vmem:[%s904_s30 + $0x180] sm:$0xff]  ;;  %v187_v31 = vld [vmem:[%s904_s30 + $0x188] sm:$0xff]  ;;  %437 = vst [vmem:[%s914_s27 + $0x158] sm:$0xff] %v599_v29  ;;  %v600_v32 = vsel %vm246_vm12, 1.0, %v782_v6  ;;  %v601_v33 = vsel %vm247_vm13, 1.0, %v782_v6  ;;  %v602_v34 = vsel %vm248_vm14, 1.0, %v782_v6 }
  0x58   : > { %vm249_vm15 = vcmp.gt.f32.partialorder %v185_v28, 0.0  ;;  %v188_v35 = vld [vmem:[%s904_s30 + $0x190] sm:$0xff]  ;;  %v189_v36 = vld [vmem:[%s904_s30 + $0x198] sm:$0xff]  ;;  %438 = vst [vmem:[%s914_s27 + $0x160] sm:$0xff] %v600_v32  ;;  %439 = vst [vmem:[%s914_s27 + $0x168] sm:$0xff] %v601_v33  ;;  %vm250_vm0 = vcmp.gt.f32.partialorder %v186_v30, 0.0 }
  0x59   : > { %440 = vst [vmem:[%s914_s27 + $0x170] sm:$0xff] %v602_v34  ;;  %v603_v37 = vsel %vm249_vm15, 1.0, %v782_v6  ;;  %vm251_vm1 = vcmp.gt.f32.partialorder %v187_v31, 0.0  ;;  %vm252_vm2 = vcmp.gt.f32.partialorder %v188_v35, 0.0  ;;  %v190_v38 = vld [vmem:[%s904_s30 + $0x1a0] sm:$0xff]  ;;  %v191_v39 = vld [vmem:[%s904_s30 + $0x1a8] sm:$0xff] }
  0x5a   : > { %441 = vst [vmem:[%s914_s27 + $0x178] sm:$0xff] %v603_v37  ;;  %v604_v40 = vsel %vm250_vm0, 1.0, %v782_v6  ;;  %v605_v41 = vsel %vm251_vm1, 1.0, %v782_v6  ;;  %v606_v42 = vsel %vm252_vm2, 1.0, %v782_v6  ;;  %vm253_vm3 = vcmp.gt.f32.partialorder %v189_v36, 0.0  ;;  %v192_v43 = vld [vmem:[%s904_s30 + $0x1b0] sm:$0xff] }
  0x5b   : > { %v193_v44 = vld [vmem:[%s904_s30 + $0x1b8] sm:$0xff]  ;;  %442 = vst [vmem:[%s914_s27 + $0x180] sm:$0xff] %v604_v40  ;;  %443 = vst [vmem:[%s914_s27 + $0x188] sm:$0xff] %v605_v41  ;;  %v607_v45 = vsel %vm253_vm3, 1.0, %v782_v6  ;;  %vm254_vm4 = vcmp.gt.f32.partialorder %v190_v38, 0.0  ;;  %vm255_vm5 = vcmp.gt.f32.partialorder %v191_v39, 0.0 }
  0x5c   : > { %444 = vst [vmem:[%s914_s27 + $0x190] sm:$0xff] %v606_v42  ;;  %vm256_vm6 = vcmp.gt.f32.partialorder %v192_v43, 0.0  ;;  %v194_v46 = vld [vmem:[%s904_s30 + $0x1c0] sm:$0xff]  ;;  %v195_v47 = vld [vmem:[%s904_s30 + $0x1c8] sm:$0xff]  ;;  %445 = vst [vmem:[%s914_s27 + $0x198] sm:$0xff] %v607_v45  ;;  %v608_v48 = vsel %vm254_vm4, 1.0, %v782_v6 }
  0x5d   : > { %v609_v49 = vsel %vm255_vm5, 1.0, %v782_v6  ;;  %v610_v50 = vsel %vm256_vm6, 1.0, %v782_v6  ;;  %vm257_vm7 = vcmp.gt.f32.partialorder %v193_v44, 0.0  ;;  %v196_v51 = vld [vmem:[%s904_s30 + $0x1d0] sm:$0xff]  ;;  %v197_v52 = vld [vmem:[%s904_s30 + $0x1d8] sm:$0xff]  ;;  %446 = vst [vmem:[%s914_s27 + $0x1a0] sm:$0xff] %v608_v48 }
  0x5e   : > { %447 = vst [vmem:[%s914_s27 + $0x1a8] sm:$0xff] %v609_v49  ;;  %448 = vst [vmem:[%s914_s27 + $0x1b0] sm:$0xff] %v610_v50  ;;  %v611_v53 = vsel %vm257_vm7, 1.0, %v782_v6  ;;  %vm258_vm8 = vcmp.gt.f32.partialorder %v194_v46, 0.0  ;;  %vm259_vm9 = vcmp.gt.f32.partialorder %v195_v47, 0.0  ;;  %vm260_vm10 = vcmp.gt.f32.partialorder %v196_v51, 0.0 }
  0x5f   : > { %v198_v54 = vld [vmem:[%s904_s30 + $0x1e0] sm:$0xff]  ;;  %v199_v55 = vld [vmem:[%s904_s30 + $0x1e8] sm:$0xff]  ;;  %449 = vst [vmem:[%s914_s27 + $0x1b8] sm:$0xff] %v611_v53  ;;  %v612_v56 = vsel %vm258_vm8, 1.0, %v782_v6  ;;  %v613_v57 = vsel %vm259_vm9, 1.0, %v782_v6  ;;  %v614_v58 = vsel %vm260_vm10, 1.0, %v782_v6 }
  0x60   : > { %vm261_vm11 = vcmp.gt.f32.partialorder %v197_v52, 0.0  ;;  %v200_v59 = vld [vmem:[%s904_s30 + $0x1f0] sm:$0xff]  ;;  %v201_v60 = vld [vmem:[%s904_s30 + $0x1f8] sm:$0xff]  ;;  %450 = vst [vmem:[%s914_s27 + $0x1c0] sm:$0xff] %v612_v56  ;;  %451 = vst [vmem:[%s914_s27 + $0x1c8] sm:$0xff] %v613_v57  ;;  %vm262_vm12 = vcmp.gt.f32.partialorder %v198_v54, 0.0 }
  0x61   : > { %452 = vst [vmem:[%s914_s27 + $0x1d0] sm:$0xff] %v614_v58  ;;  %v615_v61 = vsel %vm261_vm11, 1.0, %v782_v6  ;;  %vm263_vm13 = vcmp.gt.f32.partialorder %v199_v55, 0.0  ;;  %vm264_vm14 = vcmp.gt.f32.partialorder %v200_v59, 0.0  ;;  %v616_v62 = vsel %vm262_vm12, 1.0, %v782_v6  ;;  %s459_s10 = scalar_lea.sflag [#allocation4], %s900_s23 }
  0x62   : > { %453 = vst [vmem:[%s914_s27 + $0x1d8] sm:$0xff] %v615_v61  ;;  %v617_v63 = vsel %vm263_vm13, 1.0, %v782_v6  ;;  %v618_v0 = vsel %vm264_vm14, 1.0, %v782_v6  ;;  %vm265_vm15 = vcmp.gt.f32.partialorder %v201_v60, 0.0  ;;  %454 = vst [vmem:[%s914_s27 + $0x1e0] sm:$0xff] %v616_v62  ;;  %s711_s3 = scalar_lea.vmem %s1106_s17, 8192 }
  0x63   : > { %455 = vst [vmem:[%s914_s27 + $0x1e8] sm:$0xff] %v617_v63  ;;  %456 = vst [vmem:[%s914_s27 + $0x1f0] sm:$0xff] %v618_v0  ;;  %v619_v1 = vsel %vm265_vm15, 1.0, %v782_v6  ;;  %p712_p6 = scmp.ne.s32.totalorder %s1106_s17, %s711_s3  ;;  %p1167_p11 = scmp.ne.s32.totalorder %s1164_s18, 0 }
  0x64   : > { %457 = vst [vmem:[%s914_s27 + $0x1f8] sm:$0xff] %v619_v1  ;;  %s783_s4 = smov [#allocation5]  }
  0x65   : > { %p713_p12 = pnand %p712_p6, %p1167_p11  ;;  %s715_s5 = sshll.u32 %s783_s4, 4  ;;  %s716_s5 = int_to_ptr.vmem [resolvable:$false] %s715_s5 }
  0x66   : > { %s717_s11 = scalar_lea.vmem %s716_s5, 16384  ;;  %p718_p8 = scmp.lt.s32.totalorder %s1106_s17, %s716_s5 }
  0x67   : > { %p714_p13 = pneg %p713_p12  ;;  %p719_p10 = scmp.lt.s32.totalorder %s717_s11, %s711_s3 }
  0x69   : > { %p720_p0 = por %p719_p10, %p718_p8 }
  0x6b   : > { %p721_p2 = pnand %p720_p0, %p714_p13 }
  0x6d   : > { %724 = shalt.err (!%p721_p2)
}
  0x6e   : > { %s725_s13 = scalar_lea.hbm %s1102_s2, 8192  ;;  %s729_s20 = scalar_lea.hbm %s1160_s1, 16384 }
  0x6f   : > { %p726_p4 = scmp.ne.s32.totalorder %s1102_s2, %s725_s13  ;;  %p730_p9 = scmp.lt.u32.totalorder %s1102_s2, %s1160_s1 }
  0x70   : > { %p731_p1 = scmp.lt.u32.totalorder %s729_s20, %s725_s13  ;;  %p733_p6 = scmp.lt.u32.totalorder %s725_s13, %s1102_s2 }
  0x71   : > { %p727_p5 = pnand %p726_p4, %p1167_p11 }
  0x72   : > { %p732_p3 = por %p731_p1, %p730_p9 }
  0x73   : > { %p728_p7 = pneg %p727_p5 }
  0x74   : > { %p734_p12 = por %p733_p6, %p732_p3 }
  0x76   : > { %p735_p13 = pnand %p734_p12, %p728_p7 }
  0x78   : > { %738 = shalt.err (!%p735_p13)
}
  0x79   : > { %s784_s24 = smov 4096   ;;  %s785_s26 = smov 256  }
  0x7a   : > { %632 = dma.vmem_to_hbm [thread:$0]  (%p1167_p11), %s1106_s17, 8192, %s1102_s2, %s459_s10, %s784_s24, %s784_s24, %s785_s26  }
  0x7b PF: > { %s488_s30 = sand.u32 1, %s765_s6   ;;  %p1168_p8 = scmp.ne.s32.totalorder %s1165_s19, 0 }
  0x7c   : > { %p1169_p10 = scmp.ge.s32.totalorder %s777_s9, 2  ;;  %s489_s25 = scalar_lea.sflag [#allocation4], %s488_s30 }
  0x7e   : > { %p639_p0 = pnand %p1169_p10, %p1168_p8 }
  0x80   : > { %760 = dma.done.wait (!%p639_p0), %s489_s25, 8192  }
  0x81   : > { %762 = vsyncadd (!%p639_p0), %s489_s25, 4294959104  ;;  %p14_p2 = scmp.ge.s32.totalorder %s821_s12, 4   ;;  %s1170_s6 = smov %s769_s7 }
  0x82   : > { %s1171_s7 = smov %s773_s8  ;;  %s1172_s8 = smov %s833_s15 }
  0x83   : > { %s1173_s9 = smov %s821_s12  ;;  %16 = sbr.rel (!%p14_p2) target bundleno = 5 (0x5), region = 69 }
  0x8a   :  { %494 = vsyncpa [#allocation3], 1 }
  0x8b   :  { %496 = vsyncpa [#allocation3 + $0x1], 1 }
  0x8c   :  { %497 = vsyncpa [#allocation4], 1 }
  0x8d   :  { %499 = vsyncpa [#allocation4 + $0x1], 1 }

</bundles_post_ra>
